<compile_context>
chip_gen: v7x
topology: tpu7x:2x2x1
jax: 0.10.0
libtpu: 0.0.40
codegen_flags: <defaults>
</compile_context>

<pallas_src>
import functools

import jax
import jax.numpy as jnp
from jax import lax
from jax.experimental import pallas as pl
from jax.experimental.pallas import tpu as pltpu

LN_EPS = 1e-5


def _gelu(x):
    return jax.nn.gelu(x, approximate=True)


def _nbytes(shape, dtype):
    n = 1
    for s in shape:
        n *= int(s)
    return n * jnp.dtype(dtype).itemsize


def _vmem_limit(est_bytes):
    # 2x headroom + 2 MiB, floored at 16 MiB, capped below physical VMEM.
    return int(max(16 << 20, min(96 << 20, 2 * est_bytes + (2 << 20))))


# ---------------------------------------------------------------------------
# Kernel 1: frontend — im2col position conv + GELU + residual, LayerNorm over
#           channels, 1x1 conv C -> 3C, start-token prepend. One batch element
#           per grid step; output layout (B, L, D), D on the lane axis.
# ---------------------------------------------------------------------------
def _frontend_kernel(start_token, xpad_ref, w2d_ref, bconv_ref, gamma_ref,
                     beta_ref, wcond_ref, bcond_ref, o_ref):
    # xpad_ref : (1, C, T + 2*pad) f32
    # w2d_ref  : (C, K*C) bf16      im2col-ordered dense block-diag conv weight
    # bconv/gamma/beta : (C, 1) f32
    # wcond_ref: (C, D) bf16        1x1 conv weight, pre-transposed
    # bcond_ref: (1, D) f32
    # o_ref    : (1, L, D) f32      row 0 = start token, rows 1..T = features
    L = o_ref.shape[1]
    T = L - 1
    C = xpad_ref.shape[1]
    K = w2d_ref.shape[1] // C
    pad = K // 2
    D = o_ref.shape[2]

    xp = xpad_ref[0]                                        # (C, Tp) f32

    # im2col: rows ordered tap-major then channel (matches host weight layout),
    # one deep-contraction MXU matmul instead of K accumulator passes.
    xcol = jnp.concatenate([xp[:, k:k + T] for k in range(K)], axis=0)  # (K*C,T)
    conv = jnp.dot(w2d_ref[...], xcol.astype(w2d_ref.dtype),
                   preferred_element_type=jnp.float32) + bconv_ref[...]  # (C, T)

    x = xp[:, pad:pad + T]                                  # original window
    h = x + _gelu(conv)                                     # x + GELU(pos_conv)

    # LayerNorm over channels (per time step); dropout == identity (eval).
    mu = jnp.mean(h, axis=0, keepdims=True)
    var = jnp.mean((h - mu) ** 2, axis=0, keepdims=True)
    hn = (h - mu) * lax.rsqrt(var + LN_EPS)
    hn = hn * gamma_ref[...] + beta_ref[...]

    # 1x1 conv C -> 3C, emitted directly in (T, D) layout (lane-dense on D).
    proj = lax.dot_general(hn.astype(wcond_ref.dtype), wcond_ref[...],
                           (((0,), (0,)), ((), ())),
                           preferred_element_type=jnp.float32) + bcond_ref[...]

    tok = jnp.full((1, D), start_token, jnp.float32)
    o_ref[0] = jnp.concatenate([tok, proj], axis=0).astype(o_ref.dtype)


# ---------------------------------------------------------------------------
# Kernel 2: one transformer encoder layer per grid step (grid = (B, n_layers)),
#           activation carried across the layer axis in a VMEM scratch, final
#           1x1 output conv fused at the last layer.
# ---------------------------------------------------------------------------
def _transformer_stack_kernel(num_heads, x_ref, wqkv_ref, bqkv_ref, wo_ref,
                              bo_ref, w1_ref, b1_ref, w2_ref, b2_ref,
                              wfin_ref, bfin_ref, o_ref, x_scr):
    # x_ref   : (1, L, D) f32
    # wqkv    : (1, D, 3D) bf16   (1/sqrt(hd) folded into the Q slice + bias)
    # bqkv    : (1, 1, 3D) f32
    # wo      : (1, D, D)  bf16;  bo: (1, 1, D) f32
    # w1      : (1, D, F)  bf16;  b1: (1, 1, F) f32
    # w2      : (1, F, D)  bf16;  b2: (1, 1, D) f32
    # wfin    : (D, Cout)  bf16;  bfin: (1, Cout) f32
    # o_ref   : (1, L, Cout) f32
    # x_scr   : (L, D) f32 VMEM scratch (carried across the layer grid axis)
    l = pl.program_id(1)
    n_layers = pl.num_programs(1)
    D = wo_ref.shape[1]
    hd = D // num_heads
    cdims = (((1,), (1,)), ((), ()))                        # contract last dims

    @pl.when(l == 0)
    def _():
        x_scr[...] = x_ref[0]

    X = x_scr[...]                                          # (L, D) f32
    Xb = X.astype(wqkv_ref.dtype)

    # Fused Q/K/V projection: one wide (L,D) x (D,3D) MXU matmul.
    qkv = jnp.dot(Xb, wqkv_ref[0],
                  preferred_element_type=jnp.float32) + bqkv_ref[0]   # (L, 3D)

    heads = []
    for h in range(num_heads):                              # static unroll
        q = qkv[:, h * hd:(h + 1) * hd]
        k = qkv[:, D + h * hd:D + (h + 1) * hd]
        v = qkv[:, 2 * D + h * hd:2 * D + (h + 1) * hd]
        s = lax.dot_general(q.astype(jnp.bfloat16), k.astype(jnp.bfloat16),
                            cdims, preferred_element_type=jnp.float32)  # (L, L)
        s = s - jnp.max(s, axis=-1, keepdims=True)
        e = jnp.exp(s)
        p_attn = e * pl.reciprocal(jnp.sum(e, axis=-1, keepdims=True),
                                   approx=True)
        heads.append(jnp.dot(p_attn.astype(jnp.bfloat16),
                             v.astype(jnp.bfloat16),
                             preferred_element_type=jnp.float32))       # (L, hd)

    # Single full-depth out-projection instead of H rank-hd accumulations.
    attn_in = jnp.concatenate(heads, axis=-1)               # (L, D)
    attn = jnp.dot(attn_in.astype(wo_ref.dtype), wo_ref[0],
                   preferred_element_type=jnp.float32)
    X = X + attn + bo_ref[0]                                # residual, norm1 == id

    hid = jnp.dot(X.astype(w1_ref.dtype), w1_ref[0],
                  preferred_element_type=jnp.float32) + b1_ref[0]
    hid = _gelu(hid)
    X = X + (jnp.dot(hid.astype(w2_ref.dtype), w2_ref[0],
                     preferred_element_type=jnp.float32) + b2_ref[0])
                                                            # residual, norm2 == id
    x_scr[...] = X

    @pl.when(l == n_layers - 1)
    def _():
        o_ref[0] = (jnp.dot(X.astype(wfin_ref.dtype), wfin_ref[...],
                            preferred_element_type=jnp.float32)
                    + bfin_ref[...]).astype(o_ref.dtype)


# ---------------------------------------------------------------------------
# Host-side parameter preparation (done once): layout transforms, QKV concat,
# softmax-scale fold, bf16 weight cast.
# ---------------------------------------------------------------------------
def prepare_kernel_params(p, heads):
    C, gsz, K = p["wconv"].shape
    G = C // gsz
    D = p["wcond"].shape[0]
    hd = D // heads

    # Densify the grouped conv weight to (C, C, K), then im2col order (C, K*C).
    wdense = jnp.zeros((C, C, K), jnp.float32)
    for g in range(G):
        sl = slice(g * gsz, (g + 1) * gsz)
        wdense = wdense.at[sl, sl, :].set(p["wconv"][sl])
    w2d = jnp.transpose(wdense, (0, 2, 1)).reshape(C, K * C)

    # Fold 1/sqrt(hd) into the Q projection (weights + bias), fuse QKV.
    scale = hd ** -0.5
    win = p["win"].at[:, :D, :].multiply(scale)             # (nL, 3D, D)
    bqkv = p["bin"].at[:, :D].multiply(scale)[:, None, :]   # (nL, 1, 3D)
    wqkv = jnp.transpose(win, (0, 2, 1))                    # (nL, D, 3D)

    return {
        "w2d": w2d.astype(jnp.bfloat16),
        "bconv": p["bconv"][:, None],
        "gamma": p["gamma"][:, None],
        "beta": p["beta"][:, None],
        "wcond": jnp.transpose(p["wcond"]).astype(jnp.bfloat16),        # (C, D)
        "bcond": p["bcond"][None, :],
        "wqkv": wqkv.astype(jnp.bfloat16),
        "bqkv": bqkv,
        "wo": jnp.transpose(p["wout"], (0, 2, 1)).astype(jnp.bfloat16), # (nL,D,D)
        "bo": p["bout"][:, None, :],
        "w1": jnp.transpose(p["w1"], (0, 2, 1)).astype(jnp.bfloat16),   # (nL,D,F)
        "b1": p["b1"][:, None, :],
        "w2": jnp.transpose(p["w2"], (0, 2, 1)).astype(jnp.bfloat16),   # (nL,F,D)
        "b2": p["b2"][:, None, :],
        "wfin": jnp.transpose(p["wfin"]).astype(jnp.bfloat16),          # (D, C)
        "bfin": p["bfin"][None, :],
        "heads": heads,
        "kernel_size": K,
    }


# ---------------------------------------------------------------------------
# Forward wrapper
# ---------------------------------------------------------------------------
def bendr_contextualizer_forward(x, kp, start_token=-5.0):
    B, C, T = x.shape
    K = kp["kernel_size"]
    pad = K // 2
    Tp = T + 2 * pad
    D = kp["wcond"].shape[1]
    L = T + 1
    H = kp["heads"]
    nL = kp["wqkv"].shape[0]
    F = kp["w1"].shape[2]
    Cout = kp["wfin"].shape[1]
    f32, bf16 = jnp.float32, jnp.bfloat16

    xpad = jnp.pad(x, ((0, 0), (0, 0), (pad, pad)))

    fe_est = (2 * _nbytes((1, C, Tp), f32)                  # input (2 buffers)
              + _nbytes((C, K * C), bf16)                   # weights, Buffered(1)
              + 3 * _nbytes((C, 1), f32)
              + _nbytes((C, D), bf16) + _nbytes((1, D), f32)
              + 2 * _nbytes((1, L, D), f32))                # output (2 buffers)

    cond = pl.pallas_call(
        functools.partial(_frontend_kernel, float(start_token)),
        out_shape=jax.ShapeDtypeStruct((B, L, D), jnp.float32),
        grid_spec=pltpu.PrefetchScalarGridSpec(
            num_scalar_prefetch=0,
            grid=(B,),
            in_specs=[
                pl.BlockSpec((1, C, Tp), lambda b: (b, 0, 0)),
                pl.BlockSpec((C, K * C), lambda b: (0, 0),
                             pipeline_mode=pl.Buffered(1)),
                pl.BlockSpec((C, 1), lambda b: (0, 0),
                             pipeline_mode=pl.Buffered(1)),
                pl.BlockSpec((C, 1), lambda b: (0, 0),
                             pipeline_mode=pl.Buffered(1)),
                pl.BlockSpec((C, 1), lambda b: (0, 0),
                             pipeline_mode=pl.Buffered(1)),
                pl.BlockSpec((C, D), lambda b: (0, 0),
                             pipeline_mode=pl.Buffered(1)),
                pl.BlockSpec((1, D), lambda b: (0, 0),
                             pipeline_mode=pl.Buffered(1)),
            ],
            out_specs=pl.BlockSpec((1, L, D), lambda b: (b, 0, 0)),
        ),
        compiler_params=pltpu.CompilerParams(
            dimension_semantics=("parallel",),
            vmem_limit_bytes=_vmem_limit(fe_est)),
    )(xpad, kp["w2d"], kp["bconv"], kp["gamma"], kp["beta"],
      kp["wcond"], kp["bcond"])

    tr_est = (2 * _nbytes((1, L, D), f32)                   # activation input
              + 2 * (_nbytes((1, D, 3 * D), bf16) + _nbytes((1, 1, 3 * D), f32)
                     + _nbytes((1, D, D), bf16) + _nbytes((1, 1, D), f32)
                     + _nbytes((1, D, F), bf16) + _nbytes((1, 1, F), f32)
                     + _nbytes((1, F, D), bf16) + _nbytes((1, 1, D), f32))
              + _nbytes((D, Cout), bf16) + _nbytes((1, Cout), f32)
              + 2 * _nbytes((1, L, Cout), f32)
              + _nbytes((L, D), f32))                       # scratch carry

    out = pl.pallas_call(
        functools.partial(_transformer_stack_kernel, H),
        out_shape=jax.ShapeDtypeStruct((B, L, Cout), jnp.float32),
        grid_spec=pltpu.PrefetchScalarGridSpec(
            num_scalar_prefetch=0,
            grid=(B, nL),
            in_specs=[
                pl.BlockSpec((1, L, D), lambda b, l: (b, 0, 0)),
                pl.BlockSpec((1, D, 3 * D), lambda b, l: (l, 0, 0)),
                pl.BlockSpec((1, 1, 3 * D), lambda b, l: (l, 0, 0)),
                pl.BlockSpec((1, D, D), lambda b, l: (l, 0, 0)),
                pl.BlockSpec((1, 1, D), lambda b, l: (l, 0, 0)),
                pl.BlockSpec((1, D, F), lambda b, l: (l, 0, 0)),
                pl.BlockSpec((1, 1, F), lambda b, l: (l, 0, 0)),
                pl.BlockSpec((1, F, D), lambda b, l: (l, 0, 0)),
                pl.BlockSpec((1, 1, D), lambda b, l: (l, 0, 0)),
                pl.BlockSpec((D, Cout), lambda b, l: (0, 0),
                             pipeline_mode=pl.Buffered(1)),
                pl.BlockSpec((1, Cout), lambda b, l: (0, 0),
                             pipeline_mode=pl.Buffered(1)),
            ],
            out_specs=pl.BlockSpec((1, L, Cout), lambda b, l: (b, 0, 0)),
            scratch_shapes=[pltpu.VMEM((L, D), jnp.float32)],
        ),
        compiler_params=pltpu.CompilerParams(
            dimension_semantics=("parallel", "arbitrary"),
            vmem_limit_bytes=_vmem_limit(tr_est)),
    )(cond, kp["wqkv"], kp["bqkv"], kp["wo"], kp["bo"],
      kp["w1"], kp["b1"], kp["w2"], kp["b2"], kp["wfin"], kp["bfin"])

    return jnp.transpose(out, (0, 2, 1))                    # (B, C, L)


# ---------------------------------------------------------------------------
# Pure-JAX f32 reference mirroring the PyTorch eval forward.
# ---------------------------------------------------------------------------
def bendr_contextualizer_ref(x, p, heads, start_token=-5.0):
    B, C, T = x.shape
    wconv = p["wconv"]
    gsz, K = wconv.shape[1], wconv.shape[2]
    G = C // gsz
    pad = K // 2
    D = p["wcond"].shape[0]
    hd = D // heads

    wdense = jnp.zeros((C, C, K), jnp.float32)
    for g in range(G):
        sl = slice(g * gsz, (g + 1) * gsz)
        wdense = wdense.at[sl, sl, :].set(wconv[sl])
    xpad = jnp.pad(x, ((0, 0), (0, 0), (pad, pad)))
    conv = jnp.zeros((B, C, T), jnp.float32)
    for k in range(K):
        conv = conv + jnp.einsum("oi,bit->bot", wdense[:, :, k],
                                 xpad[:, :, k:k + T])
    conv = conv + p["bconv"][None, :, None]
    h = x + _gelu(conv)

    mu = jnp.mean(h, axis=1, keepdims=True)
    var = jnp.mean((h - mu) ** 2, axis=1, keepdims=True)
    hn = (h - mu) * lax.rsqrt(var + LN_EPS)
    hn = hn * p["gamma"][None, :, None] + p["beta"][None, :, None]

    y = jnp.einsum("dc,bct->bdt", p["wcond"], hn) + p["bcond"][None, :, None]
    y = jnp.transpose(y, (0, 2, 1))                         # (B, T, D)
    y = jnp.concatenate(
        [jnp.full((B, 1, D), start_token, jnp.float32), y], axis=1)
    L = T + 1

    nL = p["win"].shape[0]
    scale = hd ** -0.5
    for l in range(nL):
        qkv = jnp.einsum("bld,ed->ble", y, p["win"][l]) + p["bin"][l]
        q, k, v = qkv[..., :D], qkv[..., D:2 * D], qkv[..., 2 * D:]
        q = q.reshape(B, L, heads, hd)
        k = k.reshape(B, L, heads, hd)
        v = v.reshape(B, L, heads, hd)
        s = jnp.einsum("bqhe,bkhe->bhqk", q, k) * scale
        pr = jax.nn.softmax(s, axis=-1)
        o = jnp.einsum("bhqk,bkhe->bqhe", pr, v).reshape(B, L, D)
        y = y + jnp.einsum("ble,de->bld", o, p["wout"][l]) + p["bout"][l]
        hid = _gelu(jnp.einsum("bld,fd->blf", y, p["w1"][l]) + p["b1"][l])
        y = y + jnp.einsum("blf,df->bld", hid, p["w2"][l]) + p["b2"][l]

    out = jnp.einsum("bld,cd->blc", y, p["wfin"]) + p["bfin"][None, None, :]
    return jnp.transpose(out, (0, 2, 1))                    # (B, C, L)


if __name__ == "__main__":
    # Small, consistent config: in_features divisible by groups=16,
    # d_model = 3*in_features divisible by heads.
    B, C, T = 2, 32, 8                    # batch, in_features, seq
    GROUPS = 16
    POS_K = 9                             # position_encoder kernel size (odd)
    N_LAYERS, HEADS, FF = 2, 4, 64        # layers, heads, hidden_feedforward
    START_TOKEN = -5.0
    D = 3 * C

    key = jax.random.PRNGKey(0)
    ks = jax.random.split(key, 16)
    x = jax.random.normal(ks[0], (B, C, T), jnp.float32)

    gsz = C // GROUPS
    params = {
        # frontend (PyTorch layouts)
        "wconv": 0.05 * jax.random.normal(ks[1], (C, gsz, POS_K), jnp.float32),
        "bconv": jnp.zeros((C,), jnp.float32),               # init: constant 0
        "gamma": 1.0 + 0.1 * jax.random.normal(ks[2], (C,), jnp.float32),
        "beta": 0.1 * jax.random.normal(ks[3], (C,), jnp.float32),
        "wcond": 0.1 * jax.random.normal(ks[4], (D, C), jnp.float32),
        "bcond": 0.1 * jax.random.normal(ks[5], (D,), jnp.float32),
        # transformer (PyTorch layouts: in_proj (3D,D), out_proj (D,D), ...)
        "win": 0.05 * jax.random.normal(ks[6], (N_LAYERS, 3 * D, D), jnp.float32),
        "bin": 0.02 * jax.random.normal(ks[7], (N_LAYERS, 3 * D), jnp.float32),
        "wout": 0.05 * jax.random.normal(ks[8], (N_LAYERS, D, D), jnp.float32),
        "bout": 0.02 * jax.random.normal(ks[9], (N_LAYERS, D), jnp.float32),
        "w1": 0.05 * jax.random.normal(ks[10], (N_LAYERS, FF, D), jnp.float32),
        "b1": 0.02 * jax.random.normal(ks[11], (N_LAYERS, FF), jnp.float32),
        "w2": 0.05 * jax.random.normal(ks[12], (N_LAYERS, D, FF), jnp.float32),
        "b2": 0.02 * jax.random.normal(ks[13], (N_LAYERS, D), jnp.float32),
        "wfin": 0.1 * jax.random.normal(ks[14], (C, D), jnp.float32),
        "bfin": 0.02 * jax.random.normal(ks[15], (C,), jnp.float32),
    }

    kp = prepare_kernel_params(params, HEADS)               # host-side, once
    out = bendr_contextualizer_forward(x, kp, START_TOKEN)
    out = jax.block_until_ready(out)

    ref = bendr_contextualizer_ref(x, params, HEADS, START_TOKEN)
    assert out.shape == (B, C, T + 1), out.shape
    err = float(jnp.max(jnp.abs(out - ref)))
    # Kernel uses bf16 matmul inputs with f32 accumulation; reference is pure
    # f32, so compare at a mixed-precision-appropriate tolerance.
    assert jnp.allclose(out, ref, rtol=3e-2, atol=3e-2), err

    print("KERNEL_OK")
</pallas_src>

<mosaic_0001>
module attributes {stable_mosaic.version = 11 : i64} {
  func.func @_frontend_kernel(%arg0: i32, %arg1: memref<1x32x16xf32, #tpu.memory_space<vmem>>, %arg2: memref<32x288xbf16, #tpu.memory_space<vmem>>, %arg3: memref<32x1xf32, #tpu.memory_space<vmem>>, %arg4: memref<32x1xf32, #tpu.memory_space<vmem>>, %arg5: memref<32x1xf32, #tpu.memory_space<vmem>>, %arg6: memref<32x96xbf16, #tpu.memory_space<vmem>>, %arg7: memref<1x96xf32, #tpu.memory_space<vmem>>, %arg8: memref<1x9x96xf32, #tpu.memory_space<vmem>>) attributes {dimension_semantics = [#tpu.dimension_semantics<parallel>], iteration_bounds = array<i64: 2>, scalar_prefetch = 0 : i64, scratch_operands = 0 : i64, tpu.core_type = #tpu.core_type<tc>, window_params = [{transform_indices = @transform_0, window_bounds = array<i64: 1, 32, 16>}, {pipeline_mode = #tpu.pipeline_mode<synchronous>, transform_indices = @transform_1, window_bounds = array<i64: 32, 288>}, {pipeline_mode = #tpu.pipeline_mode<synchronous>, transform_indices = @transform_2, window_bounds = array<i64: 32, 1>}, {pipeline_mode = #tpu.pipeline_mode<synchronous>, transform_indices = @transform_3, window_bounds = array<i64: 32, 1>}, {pipeline_mode = #tpu.pipeline_mode<synchronous>, transform_indices = @transform_4, window_bounds = array<i64: 32, 1>}, {pipeline_mode = #tpu.pipeline_mode<synchronous>, transform_indices = @transform_5, window_bounds = array<i64: 32, 96>}, {pipeline_mode = #tpu.pipeline_mode<synchronous>, transform_indices = @transform_6, window_bounds = array<i64: 1, 96>}, {transform_indices = @transform_7, window_bounds = array<i64: 1, 9, 96>}]} {
    %c0 = arith.constant 0 : index
    %c0_0 = arith.constant 0 : index
    %c0_1 = arith.constant 0 : index
    %0 = vector.load %arg1[%c0, %c0_0, %c0_1] : memref<1x32x16xf32, #tpu.memory_space<vmem>>, vector<1x32x16xf32>
    %1 = vector.shape_cast %0 : vector<1x32x16xf32> to vector<32x16xf32>
    %2 = vector.extract_strided_slice %1 {offsets = [0, 0], sizes = [32, 8], strides = [1, 1]} : vector<32x16xf32> to vector<32x8xf32>
    %3 = vector.extract_strided_slice %1 {offsets = [0, 1], sizes = [32, 8], strides = [1, 1]} : vector<32x16xf32> to vector<32x8xf32>
    %4 = vector.extract_strided_slice %1 {offsets = [0, 2], sizes = [32, 8], strides = [1, 1]} : vector<32x16xf32> to vector<32x8xf32>
    %5 = vector.extract_strided_slice %1 {offsets = [0, 3], sizes = [32, 8], strides = [1, 1]} : vector<32x16xf32> to vector<32x8xf32>
    %6 = vector.extract_strided_slice %1 {offsets = [0, 4], sizes = [32, 8], strides = [1, 1]} : vector<32x16xf32> to vector<32x8xf32>
    %7 = vector.extract_strided_slice %1 {offsets = [0, 5], sizes = [32, 8], strides = [1, 1]} : vector<32x16xf32> to vector<32x8xf32>
    %8 = vector.extract_strided_slice %1 {offsets = [0, 6], sizes = [32, 8], strides = [1, 1]} : vector<32x16xf32> to vector<32x8xf32>
    %9 = vector.extract_strided_slice %1 {offsets = [0, 7], sizes = [32, 8], strides = [1, 1]} : vector<32x16xf32> to vector<32x8xf32>
    %10 = vector.extract_strided_slice %1 {offsets = [0, 8], sizes = [32, 8], strides = [1, 1]} : vector<32x16xf32> to vector<32x8xf32>
    %11 = tpu.concatenate %2, %3, %4, %5, %6, %7, %8, %9, %10 in 0 : vector<32x8xf32>, vector<32x8xf32>, vector<32x8xf32>, vector<32x8xf32>, vector<32x8xf32>, vector<32x8xf32>, vector<32x8xf32>, vector<32x8xf32>, vector<32x8xf32> -> vector<288x8xf32>
    %c0_2 = arith.constant 0 : index
    %c0_3 = arith.constant 0 : index
    %12 = vector.load %arg2[%c0_2, %c0_3] : memref<32x288xbf16, #tpu.memory_space<vmem>>, vector<32x288xbf16>
    %13 = arith.truncf %11 : vector<288x8xf32> to vector<288x8xbf16>
    %cst = arith.constant dense<0.000000e+00> : vector<32x8xf32>
    %14 = tpu.matmul %12, %13, %cst {dimension_numbers = #tpu.dot_dimension_numbers<[1], [0], [0], [1], [0, 0, 1, 1], [], []>} : vector<32x288xbf16>, vector<288x8xbf16>, vector<32x8xf32> -> vector<32x8xf32>
    %c0_4 = arith.constant 0 : index
    %c0_5 = arith.constant 0 : index
    %15 = vector.load %arg3[%c0_4, %c0_5] : memref<32x1xf32, #tpu.memory_space<vmem>>, vector<32x1xf32>
    %16 = vector.broadcast %15 : vector<32x1xf32> to vector<32x8xf32>
    %17 = arith.addf %14, %16 : vector<32x8xf32>
    %18 = vector.extract_strided_slice %1 {offsets = [0, 4], sizes = [32, 8], strides = [1, 1]} : vector<32x16xf32> to vector<32x8xf32>
    %19 = arith.mulf %17, %17 : vector<32x8xf32>
    %20 = arith.mulf %17, %19 : vector<32x8xf32>
    %cst_6 = arith.constant 4.471500e-02 : f32
    %21 = vector.broadcast %cst_6 : f32 to vector<32x8xf32>
    %22 = arith.mulf %21, %20 : vector<32x8xf32>
    %23 = arith.addf %17, %22 : vector<32x8xf32>
    %cst_7 = arith.constant 0.797884583 : f32
    %24 = vector.broadcast %cst_7 : f32 to vector<32x8xf32>
    %25 = arith.mulf %24, %23 : vector<32x8xf32>
    %26 = math.tanh %25 : vector<32x8xf32>
    %cst_8 = arith.constant 1.000000e+00 : f32
    %27 = vector.broadcast %cst_8 : f32 to vector<32x8xf32>
    %28 = arith.addf %27, %26 : vector<32x8xf32>
    %cst_9 = arith.constant 5.000000e-01 : f32
    %29 = vector.broadcast %cst_9 : f32 to vector<32x8xf32>
    %30 = arith.mulf %29, %28 : vector<32x8xf32>
    %31 = arith.mulf %17, %30 : vector<32x8xf32>
    %32 = arith.addf %18, %31 : vector<32x8xf32>
    %cst_10 = arith.constant dense<0.000000e+00> : vector<8xf32>
    %33 = vector.multi_reduction <add>, %32, %cst_10 [0] : vector<32x8xf32> to vector<8xf32>
    %34 = vector.shape_cast %33 : vector<8xf32> to vector<1x8xf32>
    %cst_11 = arith.constant 3.200000e+01 : f32
    %35 = vector.broadcast %cst_11 : f32 to vector<1x8xf32>
    %36 = arith.divf %34, %35 : vector<1x8xf32>
    %37 = vector.broadcast %36 : vector<1x8xf32> to vector<32x8xf32>
    %38 = arith.subf %32, %37 : vector<32x8xf32>
    %39 = arith.mulf %38, %38 : vector<32x8xf32>
    %cst_12 = arith.constant dense<0.000000e+00> : vector<8xf32>
    %40 = vector.multi_reduction <add>, %39, %cst_12 [0] : vector<32x8xf32> to vector<8xf32>
    %41 = vector.shape_cast %40 : vector<8xf32> to vector<1x8xf32>
    %cst_13 = arith.constant 3.200000e+01 : f32
    %42 = vector.broadcast %cst_13 : f32 to vector<1x8xf32>
    %43 = arith.divf %41, %42 : vector<1x8xf32>
    %44 = vector.broadcast %36 : vector<1x8xf32> to vector<32x8xf32>
    %45 = arith.subf %32, %44 : vector<32x8xf32>
    %cst_14 = arith.constant 9.99999974E-6 : f32
    %46 = vector.broadcast %cst_14 : f32 to vector<1x8xf32>
    %47 = arith.addf %43, %46 : vector<1x8xf32>
    %48 = math.rsqrt %47 : vector<1x8xf32>
    %49 = vector.broadcast %48 : vector<1x8xf32> to vector<32x8xf32>
    %50 = arith.mulf %45, %49 : vector<32x8xf32>
    %c0_15 = arith.constant 0 : index
    %c0_16 = arith.constant 0 : index
    %51 = vector.load %arg4[%c0_15, %c0_16] : memref<32x1xf32, #tpu.memory_space<vmem>>, vector<32x1xf32>
    %52 = vector.broadcast %51 : vector<32x1xf32> to vector<32x8xf32>
    %53 = arith.mulf %50, %52 : vector<32x8xf32>
    %c0_17 = arith.constant 0 : index
    %c0_18 = arith.constant 0 : index
    %54 = vector.load %arg5[%c0_17, %c0_18] : memref<32x1xf32, #tpu.memory_space<vmem>>, vector<32x1xf32>
    %55 = vector.broadcast %54 : vector<32x1xf32> to vector<32x8xf32>
    %56 = arith.addf %53, %55 : vector<32x8xf32>
    %57 = arith.truncf %56 : vector<32x8xf32> to vector<32x8xbf16>
    %c0_19 = arith.constant 0 : index
    %c0_20 = arith.constant 0 : index
    %58 = vector.load %arg6[%c0_19, %c0_20] : memref<32x96xbf16, #tpu.memory_space<vmem>>, vector<32x96xbf16>
    %cst_21 = arith.constant dense<0.000000e+00> : vector<8x96xf32>
    %59 = tpu.matmul %57, %58, %cst_21 {dimension_numbers = #tpu.dot_dimension_numbers<[0], [0], [1], [1], [0, 1, 1, 1], [], []>} : vector<32x8xbf16>, vector<32x96xbf16>, vector<8x96xf32> -> vector<8x96xf32>
    %c0_22 = arith.constant 0 : index
    %c0_23 = arith.constant 0 : index
    %60 = vector.load %arg7[%c0_22, %c0_23] : memref<1x96xf32, #tpu.memory_space<vmem>>, vector<1x96xf32>
    %61 = vector.broadcast %60 : vector<1x96xf32> to vector<8x96xf32>
    %62 = arith.addf %59, %61 : vector<8x96xf32>
    %cst_24 = arith.constant -5.000000e+00 : f32
    %63 = vector.broadcast %cst_24 : f32 to vector<1x96xf32>
    %64 = tpu.concatenate %63, %62 in 0 : vector<1x96xf32>, vector<8x96xf32> -> vector<9x96xf32>
    %c0_25 = arith.constant 0 : index
    %c0_26 = arith.constant 0 : index
    %c0_27 = arith.constant 0 : index
    %65 = vector.load %arg8[%c0_25, %c0_26, %c0_27] : memref<1x9x96xf32, #tpu.memory_space<vmem>>, vector<1x9x96xf32>
    %66 = vector.shape_cast %65 : vector<1x9x96xf32> to vector<9x96xf32>
    %67 = vector.shape_cast %64 : vector<9x96xf32> to vector<1x9x96xf32>
    tpu.vector_store %arg8[%c0_25, %c0_26, %c0_27], %67 {strides = array<i32>} : memref<1x9x96xf32, #tpu.memory_space<vmem>>, vector<1x9x96xf32>,
    return
  }
  func.func @transform_0(%arg0: i32) -> (i32, i32, i32) {
    %c0_i32 = arith.constant 0 : i32
    %c0_i32_0 = arith.constant 0 : i32
    %c0_i32_1 = arith.constant 0 : i32
    return %arg0, %c0_i32, %c0_i32_0 : i32, i32, i32
  }
  func.func @transform_1(%arg0: i32) -> (i32, i32) {
    %c0_i32 = arith.constant 0 : i32
    %c0_i32_0 = arith.constant 0 : i32
    %c0_i32_1 = arith.constant 0 : i32
    return %c0_i32, %c0_i32_0 : i32, i32
  }
  func.func @transform_2(%arg0: i32) -> (i32, i32) {
    %c0_i32 = arith.constant 0 : i32
    %c0_i32_0 = arith.constant 0 : i32
    %c0_i32_1 = arith.constant 0 : i32
    return %c0_i32, %c0_i32_0 : i32, i32
  }
  func.func @transform_3(%arg0: i32) -> (i32, i32) {
    %c0_i32 = arith.constant 0 : i32
    %c0_i32_0 = arith.constant 0 : i32
    %c0_i32_1 = arith.constant 0 : i32
    return %c0_i32, %c0_i32_0 : i32, i32
  }
  func.func @transform_4(%arg0: i32) -> (i32, i32) {
    %c0_i32 = arith.constant 0 : i32
    %c0_i32_0 = arith.constant 0 : i32
    %c0_i32_1 = arith.constant 0 : i32
    return %c0_i32, %c0_i32_0 : i32, i32
  }
  func.func @transform_5(%arg0: i32) -> (i32, i32) {
    %c0_i32 = arith.constant 0 : i32
    %c0_i32_0 = arith.constant 0 : i32
    %c0_i32_1 = arith.constant 0 : i32
    return %c0_i32, %c0_i32_0 : i32, i32
  }
  func.func @transform_6(%arg0: i32) -> (i32, i32) {
    %c0_i32 = arith.constant 0 : i32
    %c0_i32_0 = arith.constant 0 : i32
    %c0_i32_1 = arith.constant 0 : i32
    return %c0_i32, %c0_i32_0 : i32, i32
  }
  func.func @transform_7(%arg0: i32) -> (i32, i32, i32) {
    %c0_i32 = arith.constant 0 : i32
    %c0_i32_0 = arith.constant 0 : i32
    %c0_i32_1 = arith.constant 0 : i32
    return %arg0, %c0_i32, %c0_i32_0 : i32, i32, i32
  }
}

</mosaic_0001>

<bundles_post_ra>
// kernel: tpu_custom_call.1
= control target key start
LH: loop header
LB: loop body
LE: loop exit
PB: predicated region body
PF: predicated region fallthrough
CT: control target
= control target key end

     0   :  { %s1139_s24 = smov 0   ;;  %s1258_s0 = inlined_call_operand.vmem [shape: f32[2,32,16], index: 0, kind: input, shape index: {}]   ;;  %s1259_s1 = inlined_call_operand.vmem [shape: bf16[32,288], index: 1, kind: input, shape index: {}]   ;;  %s1260_s2 = inlined_call_operand.vmem [shape: f32[32,1], index: 2, kind: input, shape index: {}]   ;;  %s1261_s3 = inlined_call_operand.vmem [shape: f32[32,1], index: 3, kind: input, shape index: {}]   ;;  %s1262_s4 = inlined_call_operand.vmem [shape: f32[32,1], index: 4, kind: input, shape index: {}]   ;;  %s1263_s5 = inlined_call_operand.vmem [shape: bf16[32,96], index: 5, kind: input, shape index: {}]   ;;  %s1264_s6 = inlined_call_operand.vmem [shape: f32[1,96], index: 6, kind: input, shape index: {}]   ;;  %s1265_s7 = inlined_call_operand.vmem [shape: f32[2,9,96], index: 7, kind: output, shape index: {}]  }
   0x1 LB: > { %s881_s25 = sadd.s32 4294967295, %s1085_s24   ;;  %p885_p0 = scmp.ge.s32.totalorder %s1085_s24, 1  ;;  %s1085_s24 = sphi %s1139_s24, %s17_s24  }
   0x2   : > { %p237_p1 = scmp.lt.s32.totalorder %s1085_s24, 3 }
   0x4   : > { %p238_p2 = pnand %p885_p0, %p237_p1 }
   0x5   : > { %p269_p3 = scmp.lt.s32.totalorder (!%p238_p2), %s881_s25, 1  ;;  %s1087_s30 = smov (!%p238_p2), 124   ;;  %v1061_v6 = vld [vmem:[%s1259_s1 + $0x4] ss:$12 sps:$4 sm:$0xff] (!%p238_p2)   ;;  %v1062_v7 = vld [vmem:[%s1259_s1 + $0x8] ss:$12 sps:$4 sm:$0xff] (!%p238_p2)  }
   0x6   : > { %241 = sbr.rel (%p238_p2) target bundleno = 1042 (0x412), region = 48  ;;  %s1088_s8 = smov (!%p238_p2), 123   ;;  %503 = vmatprep.mubr.bf16.mxu0 (!%p238_p2), %v1061_v6  ;;  %vm464_vm0 = vcmask (!%p238_p2), 261120   ;;  %v411_v8 = vld [vmem:[%s1260_s2 + $0x8] sm:$0xff] (!%p238_p2)  ;;  %v410_v9 = vld [vmem:[%s1260_s2] sm:$0xff] (!%p238_p2)  ;;  %v1095_v10 = vmov (!%p238_p2), 0  }
   0x7   : > { %s1089_s9 = smov (!%p238_p2), 127   ;;  %s1090_s10 = smov (!%p238_p2), 122   ;;  %945 = vmatprep.mubr.msk.bf16.mxu1 (!%p238_p2), %vm464_vm0, %v1062_v7  ;;  %1058 = vset.pattern.permute.xlu1 (!%p238_p2), %v1095_v10  ;;  %v412_v11 = vld [vmem:[%s1260_s2 + $0x10] sm:$0xff] (!%p238_p2)  ;;  %v413_v12 = vld [vmem:[%s1260_s2 + $0x18] sm:$0xff] (!%p238_p2)  ;;  %vm625_vm1 = vcmask (!%p238_p2), 97312   ;;  %vm1098_vm2 = vmmov (!%p238_p2), 0  }
   0x8   : > { %s1091_s11 = smov (!%p238_p2), 126   ;;  %s1092_s12 = smov (!%p238_p2), 121   ;;  %1057 = vset.pattern.permute.xlu0 (!%p238_p2), %v1095_v10  ;;  %vm820_vm3 = vcmask (!%p238_p2), 1040384   ;;  %vm824_vm4 = vcmask (!%p238_p2), 778240   ;;  %vm822_vm5 = vcmask (!%p238_p2), 785408  }
   0x9   : > { %s1093_s13 = smov (!%p238_p2), 125   ;;  %s1094_s18 = smov (!%p238_p2), 120  }
   0xa   : > { %s1096_s15 = smov (!%p238_p2), 4  }
   0xd   : > { %s1267_s25 = smov (!%p269_p3, %s881_s25), 1 }
   0xe   : > { %s904_s26 = sshll.u32 %s1267_s25, 5 }
   0xf   : > { %s273_s29 = scalar_lea.vmem %s1258_s0, %s904_s26 }
  0x10   : > { %v1153_v0 = vld [vmem:[%s273_s29] sm:$0xff]  ;;  %v1155_v1 = vld [vmem:[%s273_s29 + $0x8] sm:$0xff]  ;;  %v1157_v2 = vld [vmem:[%s273_s29 + $0x10] sm:$0xff] }
  0x11   : > { %v977_v3 = vpack.i.bf16 %v1155_v1, %v1153_v0  ;;  %v1161_v4 = vld [vmem:[%s273_s29 + $0x18] sm:$0xff]  ;;  %v392_v17 = vpack.c.bf16 %v1155_v1, %v1153_v0 }
  0x12   : > { %v982_v5 = vpack.i.bf16 %v1161_v4, %v1157_v2  ;;  %v393_v27 = vpack.c.bf16 %v1161_v4, %v1157_v2 }
  0x13   : > { %978 = vrot.lane.b32.xlu0 %v977_v3, %s1087_s30  ;;  %988 = vrot.lane.b32.xlu1 %v977_v3, %s1088_s8 }
  0x17   : > { %983 = vrot.lane.b32.xlu0 %v982_v5, %s1087_s30  ;;  %993 = vrot.lane.b32.xlu1 %v977_v3, %s1089_s9 }
  0x1b   : > { %998 = vrot.lane.b32.xlu0 %v982_v5, %s1088_s8  ;;  %1003 = vrot.lane.b32.xlu1 %v982_v5, %s1089_s9 }
  0x1f   : > { %1008 = vrot.lane.b32.xlu0 %v977_v3, %s1090_s10  ;;  %1013 = vrot.lane.b32.xlu1 %v977_v3, %s1091_s11 }
  0x23   : > { %1018 = vrot.lane.b32.xlu0 %v982_v5, %s1090_s10  ;;  %1023 = vrot.lane.b32.xlu1 %v982_v5, %s1091_s11 }
  0x27   : > { %1028 = vrot.lane.b32.xlu0 %v977_v3, %s1092_s12  ;;  %1033 = vrot.lane.b32.xlu1 %v977_v3, %s1093_s13 }
  0x2b   : > { %1038 = vrot.lane.b32.xlu0 %v982_v5, %s1092_s12  ;;  %1043 = vrot.lane.b32.xlu1 %v982_v5, %s1093_s13 }
  0x2f   : > { %1048 = vrot.lane.b32.xlu0 %v977_v3, %s1094_s18  ;;  %1053 = vrot.lane.b32.xlu1 %v982_v5, %s1094_s18  ;;  %s905_s18 = sshll.u32 %s1267_s25, 4 }
  0x30   : > { %s278_s21 = scalar_lea.vmem %s1265_s7, %s905_s18 }
  0x33   : > { %421 = vperm.xlu1 %1058, %v411_v8   ;;  %416 = vperm.xlu0 %1057, %v410_v9  }
  0x37   : > { %426 = vperm.xlu1 %1058, %v412_v11   ;;  %431 = vperm.xlu0 %1057, %v413_v12  }
  0x85   : > { %v979_v13 = vpop.permute.xlu0 %978  ;;  %v989_v14 = vpop.permute.xlu1 %988 }
  0x86   : > { %v981_v15 = vunpack.i.h.bf16 %v979_v13  ;;  %v980_v16 = vunpack.i.l.bf16 %v979_v13  ;;  %v991_v18 = vunpack.i.h.bf16 %v989_v14  ;;  %v990_v19 = vunpack.i.l.bf16 %v989_v14 }
  0x88   : > { %v400_v20 = vpack.c.bf16 %v981_v15, %v980_v16  ;;  %v402_v28 = vpack.c.bf16 %v991_v18, %v990_v19  ;;  %v1059_v19 = vld [vmem:[%s1259_s1] ss:$12 sps:$4 sm:$0xff]  }
  0x89   : > { %v984_v21 = vpop.permute.xlu0 %983  ;;  %v994_v22 = vpop.permute.xlu1 %993 }
  0x8a   : > { %v986_v23 = vunpack.i.h.bf16 %v984_v21  ;;  %v985_v24 = vunpack.i.l.bf16 %v984_v21  ;;  %906 = vmatprep.subr.bf16.mxu0 %v400_v20  ;;  %v996_v25 = vunpack.i.h.bf16 %v994_v22  ;;  %v995_v26 = vunpack.i.l.bf16 %v994_v22  ;;  %v1064_v20 = vld [vmem:[%s1259_s1 + $0x1c] ss:$12 sps:$4 sm:$0xff]   ;;  %v1063_v21 = vld [vmem:[%s1259_s1 + $0x20] ss:$12 sps:$4 sm:$0xff]   ;;  %v1066_v22 = vld [vmem:[%s1259_s1 + $0x18] ss:$12 sps:$4 sm:$0xff]  }
  0x8b   : > { %907 = vmatpush3.bf16.msra.mxu0 %v392_v17 }
  0x8c   : > { %v401_v29 = vpack.c.bf16 %v986_v23, %v985_v24  ;;  %v394_v34 = vpack.c.bf16 %v996_v25, %v995_v26 }
  0x8d   : > { %v999_v30 = vpop.permute.xlu0 %998  ;;  %v1004_v31 = vpop.permute.xlu1 %1003 }
  0x8e   : > { %v1001_v32 = vunpack.i.h.bf16 %v999_v30  ;;  %v1000_v33 = vunpack.i.l.bf16 %v999_v30  ;;  %908 = vmatprep.subr.bf16.mxu0 %v401_v29  ;;  %v1006_v35 = vunpack.i.h.bf16 %v1004_v31  ;;  %v1005_v36 = vunpack.i.l.bf16 %v1004_v31 }
  0x8f   : > { %909 = vmatpush3.bf16.msra.mxu0 %v393_v27 }
  0x90   : > { %v403_v37 = vpack.c.bf16 %v1001_v32, %v1000_v33  ;;  %910 = vmatprep.subr.bf16.mxu0 %v402_v28  ;;  %v395_v42 = vpack.c.bf16 %v1006_v35, %v1005_v36 }
  0x91   : > { %v1009_v38 = vpop.permute.xlu0 %1008  ;;  %v1014_v39 = vpop.permute.xlu1 %1013 }
  0x92   : > { %v1011_v40 = vunpack.i.h.bf16 %v1009_v38  ;;  %v1010_v41 = vunpack.i.l.bf16 %v1009_v38  ;;  %v1016_v43 = vunpack.i.h.bf16 %v1014_v39  ;;  %v1015_v44 = vunpack.i.l.bf16 %v1014_v39 }
  0x93   : > { %911 = vmatpush3.bf16.msra.mxu0 %v394_v34 }
  0x94   : > { %v404_v45 = vpack.c.bf16 %v1011_v40, %v1010_v41  ;;  %912 = vmatprep.subr.bf16.mxu0 %v403_v37  ;;  %v396_v50 = vpack.c.bf16 %v1016_v43, %v1015_v44 }
  0x95   : > { %v1019_v46 = vpop.permute.xlu0 %1018  ;;  %v1024_v47 = vpop.permute.xlu1 %1023 }
  0x96   : > { %v1021_v48 = vunpack.i.h.bf16 %v1019_v46  ;;  %v1020_v49 = vunpack.i.l.bf16 %v1019_v46  ;;  %v1026_v51 = vunpack.i.h.bf16 %v1024_v47  ;;  %v1025_v52 = vunpack.i.l.bf16 %v1024_v47 }
  0x97   : > { %913 = vmatpush3.bf16.msra.mxu0 %v395_v42 }
  0x98   : > { %v405_v53 = vpack.c.bf16 %v1021_v48, %v1020_v49  ;;  %914 = vmatprep.subr.bf16.mxu0 %v404_v45  ;;  %v397_v58 = vpack.c.bf16 %v1026_v51, %v1025_v52 }
  0x99   : > { %v1029_v54 = vpop.permute.xlu0 %1028  ;;  %v1034_v55 = vpop.permute.xlu1 %1033 }
  0x9a   : > { %v1031_v56 = vunpack.i.h.bf16 %v1029_v54  ;;  %v1030_v57 = vunpack.i.l.bf16 %v1029_v54  ;;  %v1036_v59 = vunpack.i.h.bf16 %v1034_v55  ;;  %v1035_v60 = vunpack.i.l.bf16 %v1034_v55 }
  0x9b   : > { %915 = vmatpush3.bf16.msra.mxu0 %v396_v50 }
  0x9c   : > { %v406_v61 = vpack.c.bf16 %v1031_v56, %v1030_v57  ;;  %916 = vmatprep.subr.bf16.mxu0 %v405_v53  ;;  %v398_v6 = vpack.c.bf16 %v1036_v59, %v1035_v60 }
  0x9d   : > { %v1039_v62 = vpop.permute.xlu0 %1038  ;;  %v1044_v63 = vpop.permute.xlu1 %1043 }
  0x9e   : > { %v1041_v3 = vunpack.i.h.bf16 %v1039_v62  ;;  %v1040_v5 = vunpack.i.l.bf16 %v1039_v62  ;;  %v1046_v7 = vunpack.i.h.bf16 %v1044_v63  ;;  %v1045_v8 = vunpack.i.l.bf16 %v1044_v63 }
  0x9f   : > { %917 = vmatpush3.bf16.msra.mxu0 %v397_v58 }
  0xa0   : > { %v407_v9 = vpack.c.bf16 %v1041_v3, %v1040_v5  ;;  %918 = vmatprep.subr.bf16.mxu0 %v406_v61  ;;  %v399_v16 = vpack.c.bf16 %v1046_v7, %v1045_v8 }
  0xa1   : > { %v1049_v10 = vpop.permute.xlu0 %1048  ;;  %v1054_v11 = vpop.permute.xlu1 %1053 }
  0xa2   : > { %v1051_v12 = vunpack.i.h.bf16 %v1049_v10  ;;  %v1050_v13 = vunpack.i.l.bf16 %v1049_v10  ;;  %v1056_v14 = vunpack.i.h.bf16 %v1054_v11  ;;  %v1055_v15 = vunpack.i.l.bf16 %v1054_v11 }
  0xa3   : > { %919 = vmatpush3.bf16.msra.mxu0 %v398_v6 }
  0xa4   : > { %v409_v17 = vpack.c.bf16 %v1056_v14, %v1055_v15  ;;  %920 = vmatprep.subr.bf16.mxu0 %v407_v9  ;;  %v408_v18 = vpack.c.bf16 %v1051_v12, %v1050_v13 }
  0xa6   : > { %941 = vmatprep.subr.bf16.mxu1 %v408_v18 }
  0xa7   : > { %921 = vmatpush3.bf16.msra.mxu0 %v399_v16  ;;  %942 = vmatpush3.bf16.msra.mxu1 %v408_v18 }
  0xa8   : > { %943 = vmatprep.subr.bf16.mxu1 %v409_v17 }
  0xaa   : > { %504 = vmatmul.mubr.bf16.vlgmr.msra.gmra.mrb[0].mxu0 %v1059_v19 }
  0xab   : > { %944 = vmatpush3.bf16.msra.mxu1 %v409_v17  ;;  %511 = vmatprep.mubr.bf16.mxu0 %v1064_v20 }
  0xae   : > { %946 = vmatmul.mubr.msk.bf16.vlgmr.msra.gmra.mrb[0].mxu1 %vm464_vm0, %v1063_v21 }
  0xb2   : > { %512 = vmatmul.mubr.bf16.gmra.mrb[4].mxu0 %v1066_v22  ;;  %v417_v25 = vpop.permute.xlu0 %416  ;;  %v422_v32 = vpop.permute.xlu1 %421 }
  0xb6   : > { %v427_v46 = vpop.permute.xlu1 %426  ;;  %v432_v52 = vpop.permute.xlu0 %431 }
 0x17d   : > { %v922_v23 = vpop.f32.mrb[0].mxu0 }
 0x17e   : > { %v923_v24 = vpop.f32.mrb[1].mxu0 }
 0x17f   : > { %v924_v26 = vadd.f32 %v923_v24, %v922_v23  ;;  %v925_v27 = vpop.f32.mrb[2].mxu0 }
 0x180   : > { %v926_v28 = vpop.f32.mrb[3].mxu0 }
 0x181   : > { %v506_v29 = vadd.f32 %v924_v26, %v417_v25  ;;  %v927_v30 = vadd.f32 %v926_v28, %v925_v27  ;;  %v947_v31 = vpop.f32.mrb[0].mxu1  ;;  %v669_v27 = vld [vmem:[%s1261_s3] sm:$0xff]  ;;  %v670_v28 = vld [vmem:[%s1261_s3 + $0x8] sm:$0xff] }
 0x182   : > { %v554_v33 = vpop.f32.mrb[1].mxu1 }
 0x183   : > { %v555_v34 = vadd.f32 %v554_v33, %v506_v29  ;;  %v948_v35 = vpop.f32.mrb[2].mxu1  ;;  %v509_v36 = vadd.f32 %v927_v30, %v422_v32  ;;  %v671_v29 = vld [vmem:[%s1261_s3 + $0x10] sm:$0xff]  ;;  %v672_v30 = vld [vmem:[%s1261_s3 + $0x18] sm:$0xff]  ;;  %v698_v32 = vld [vmem:[%s1262_s4 + $0x8] sm:$0xff] }
 0x184   : > { %v557_v37 = vpop.f32.mrb[3].mxu1  ;;  %v699_v33 = vld [vmem:[%s1262_s4 + $0x10] sm:$0xff] }
 0x185   : > { %v569_v38 = vmul.f32 %v555_v34, %v555_v34  ;;  %v558_v39 = vadd.f32 %v557_v37, %v509_v36  ;;  %v928_v40 = vpop.f32.mrb[4].mxu0 }
 0x186   : > { %v929_v41 = vpop.f32.mrb[5].mxu0 }
 0x187   : > { %v573_v42 = vmul.f32 %v569_v38, %v555_v34  ;;  %v570_v43 = vmul.f32 %v558_v39, %v558_v39  ;;  %v930_v44 = vadd.f32 %v929_v41, %v928_v40  ;;  %v931_v45 = vpop.f32.mrb[6].mxu0 }
 0x188   : > { %v932_v47 = vpop.f32.mrb[7].mxu0 }
 0x189   : > { %v577_v48 = vmul.f32 0.044715, %v573_v42  ;;  %v574_v49 = vmul.f32 %v570_v43, %v558_v39  ;;  %v514_v50 = vadd.f32 %v930_v44, %v427_v46  ;;  %v933_v51 = vadd.f32 %v932_v47, %v931_v45 }
 0x18b   : > { %v581_v53 = vadd.f32 %v577_v48, %v555_v34  ;;  %v578_v54 = vmul.f32 0.044715, %v574_v49  ;;  %v563_v55 = vadd.f32 %v947_v31, %v514_v50  ;;  %v517_v56 = vadd.f32 %v933_v51, %v432_v52  ;;  %v697_v31 = vld [vmem:[%s1262_s4] sm:$0xff] }
 0x18d   : > { %v585_v57 = vmul.f32 0.7978846, %v581_v53  ;;  %v582_v58 = vadd.f32 %v578_v54, %v558_v39  ;;  %v571_v59 = vmul.f32 %v563_v55, %v563_v55  ;;  %v566_v60 = vadd.f32 %v948_v35, %v517_v56 }
 0x18f   : > { %v586_v61 = vmul.f32 0.7978846, %v582_v58  ;;  %v575_v62 = vmul.f32 %v571_v59, %v563_v55  ;;  %v572_v63 = vmul.f32 %v566_v60, %v566_v60  ;;  %1069 = vtanh.f32 %v585_v57 }
 0x191   : > { %v576_v3 = vmul.f32 %v572_v63, %v566_v60  ;;  %1071 = vtanh.f32 %v586_v61  ;;  %v579_v5 = vmul.f32 0.044715, %v575_v62 }
 0x193   : > { %v583_v6 = vadd.f32 %v579_v5, %v563_v55  ;;  %v580_v7 = vmul.f32 0.044715, %v576_v3 }
 0x195   : > { %v587_v8 = vmul.f32 0.7978846, %v583_v6  ;;  %v584_v9 = vadd.f32 %v580_v7, %v566_v60 }
 0x197   : > { %1073 = vtanh.f32 %v587_v8  ;;  %v588_v10 = vmul.f32 0.7978846, %v584_v9 }
 0x199   : > { %v1070_v11 = vpop.eup %1069  ;;  %1075 = vtanh.f32 %v588_v10 }
 0x19a   : > { %v593_v12 = vadd.f32 1.0, %v1070_v11 }
 0x19b   : > { %v1072_v13 = vpop.eup %1071 }
 0x19c   : > { %v597_v14 = vmul.f32 0.5, %v593_v12  ;;  %v594_v15 = vadd.f32 1.0, %v1072_v13 }
 0x19e   : > { %v601_v16 = vmul.f32 %v597_v14, %v555_v34  ;;  %v598_v17 = vmul.f32 0.5, %v594_v15  ;;  %v700_v34 = vld [vmem:[%s1262_s4 + $0x18] sm:$0xff] }
 0x1a0   : > { %609 = vrot.lane.b32.xlu1 %v601_v16, %s1096_s15  ;;  %v602_v18 = vmul.f32 %v598_v17, %v558_v39 }
 0x1a1   : > { %v1074_v19 = vpop.eup %1073 }
 0x1a2   : > { %611 = vrot.lane.b32.xlu0 %v602_v18, %s1096_s15  ;;  %v595_v20 = vadd.f32 1.0, %v1074_v19 }
 0x1a3   : > { %v1076_v21 = vpop.eup %1075 }
 0x1a4   : > { %v599_v22 = vmul.f32 0.5, %v595_v20  ;;  %v596_v23 = vadd.f32 1.0, %v1076_v21 }
 0x1a6   : > { %v603_v24 = vmul.f32 %v599_v22, %v563_v55  ;;  %v600_v25 = vmul.f32 0.5, %v596_v23  ;;  %v1067_v23 = vld [vmem:[%s1263_s5] sm:$0xff]  }
 0x1a8   : > { %613 = vrot.lane.b32.xlu1 %v603_v24, %s1096_s15  ;;  %v604_v26 = vmul.f32 %v600_v25, %v566_v60 }
 0x1aa   : > { %615 = vrot.lane.b32.xlu0 %v604_v26, %s1096_s15 }
 0x1ac   : > { %675 = vperm.xlu1 %1058, %v669_v27  }
 0x1ae   : > { %680 = vperm.xlu0 %1057, %v670_v28   ;;  %v1097_v28 = vmov 0.0  }
 0x1af   : > { %949 = vmatprep.subr.bf16.mxu1 %v1097_v28  ;;  %953 = vmatprep.mubr.msk.bf16.mxu1 %vm1098_vm2, %v1097_v28 }
 0x1b0   : > { %685 = vperm.xlu1 %1058, %v671_v29   ;;  %950 = vmatpush3.bf16.msra.mxu1 %v1067_v23  ;;  %v1068_v29 = vld [vmem:[%s1263_s5 + $0x8] sm:$0xff]  }
 0x1b1   : > { %951 = vmatprep.subr.bf16.mxu1 %v1097_v28 }
 0x1b2   : > { %690 = vperm.xlu0 %1057, %v672_v30  }
 0x1b4   : > { %703 = vperm.xlu1 %1058, %v697_v31   ;;  %952 = vmatpush3.bf16.msra.mxu1 %v1068_v29 }
 0x1b6   : > { %708 = vperm.xlu0 %1057, %v698_v32  }
 0x1b8   : > { %713 = vperm.xlu1 %1058, %v699_v33  }
 0x1ba   : > { %718 = vperm.xlu0 %1057, %v700_v34  }
 0x212   : > { %v610_v35 = vpop.permute.xlu1 %609 }
 0x213   : > { %v621_v38 = vadd.f32 %v610_v35, %v1153_v0 }
 0x214   : > { %v612_v36 = vpop.permute.xlu0 %611 }
 0x215   : > { %v622_v37 = vadd.f32 %v612_v36, %v1155_v1  ;;  %v626_v41 = vsel %vm625_vm1, %v621_v38, 0.0 }
 0x217   : > { %v627_v39 = vsel %vm625_vm1, %v622_v37, 0.0 }
 0x218   : > { %v628_v43 = vadd.f32 %v627_v39, %v626_v41 }
 0x21a   : > { %v614_v40 = vpop.permute.xlu1 %613 }
 0x21b   : > { %v623_v42 = vadd.f32 %v614_v40, %v1157_v2 }
 0x21c   : > { %v616_v44 = vpop.permute.xlu0 %615 }
 0x21d   : > { %v629_v45 = vsel %vm625_vm1, %v623_v42, 0.0  ;;  %v624_v46 = vadd.f32 %v616_v44, %v1161_v4 }
 0x21e   : > { %v630_v47 = vadd.f32 %v629_v45, %v628_v43  ;;  %v898_v45 = vld [vmem:[%s1264_s6] ss:$0 sm:$0xff] }
 0x21f   : > { %v631_v48 = vsel %vm625_vm1, %v624_v46, 0.0 }
 0x220   : > { %v632_v1 = vadd.f32 %v631_v48, %v630_v47 }
 0x222   : > { %v633_v49 = vrot.slane %v632_v1, 4 }
 0x224   : > { %v634_v0 = vadd.f32 %v633_v49, %v632_v1 }
 0x226   : > { %v635_v50 = vrot.slane %v634_v0, 2 }
 0x228   : > { %v636_v51 = vadd.f32 %v635_v50, %v634_v0 }
 0x22a   : > { %v637_v52 = vrot.slane %v636_v51, 1 }
 0x22b   : > { %v676_v15 = vpop.permute.xlu1 %675 }
 0x22c   : > { %v638_v53 = vadd.f32 %v637_v52, %v636_v51 }
 0x22d   : > { %v681_v16 = vpop.permute.xlu0 %680 }
 0x22e   : > { %v640_v54 = vmul.f32 0.03125, %v638_v53 }
 0x22f   : > { %v686_v18 = vpop.permute.xlu1 %685 }
 0x230   : > { %v642_v55 = vsub.f32 %v622_v37, %v640_v54  ;;  %v643_v56 = vsub.f32 %v623_v42, %v640_v54  ;;  %v644_v2 = vsub.f32 %v624_v46, %v640_v54  ;;  %v641_v57 = vsub.f32 %v621_v38, %v640_v54 }
 0x231   : > { %v691_v19 = vpop.permute.xlu0 %690 }
 0x232   : > { %v645_v58 = vmul.f32 %v641_v57, %v641_v57  ;;  %v646_v59 = vmul.f32 %v642_v55, %v642_v55  ;;  %v647_v60 = vmul.f32 %v643_v56, %v643_v56  ;;  %v648_v61 = vmul.f32 %v644_v2, %v644_v2 }
 0x233   : > { %v704_v20 = vpop.permute.xlu1 %703 }
 0x234   : > { %v649_v4 = vsel %vm625_vm1, %v645_v58, 0.0  ;;  %v650_v62 = vsel %vm625_vm1, %v646_v59, 0.0  ;;  %v652_v3 = vsel %vm625_vm1, %v647_v60, 0.0  ;;  %v654_v6 = vsel %vm625_vm1, %v648_v61, 0.0 }
 0x235   : > { %v651_v63 = vadd.f32 %v650_v62, %v649_v4  ;;  %v709_v21 = vpop.permute.xlu0 %708 }
 0x237   : > { %v653_v5 = vadd.f32 %v652_v3, %v651_v63  ;;  %v714_v34 = vpop.permute.xlu1 %713 }
 0x239   : > { %v655_v7 = vadd.f32 %v654_v6, %v653_v5  ;;  %v719_v35 = vpop.permute.xlu0 %718 }
 0x23b   : > { %v656_v8 = vrot.slane %v655_v7, 4 }
 0x23d   : > { %v657_v9 = vadd.f32 %v656_v8, %v655_v7 }
 0x23f   : > { %v658_v10 = vrot.slane %v657_v9, 2 }
 0x241   : > { %v659_v11 = vadd.f32 %v658_v10, %v657_v9 }
 0x243   : > { %v660_v12 = vrot.slane %v659_v11, 1 }
 0x245   : > { %v661_v13 = vadd.f32 %v660_v12, %v659_v11 }
 0x247   : > { %v662_v14 = vmul.f32 0.03125, %v661_v13 }
 0x249   : > { %v663_v17 = vadd.f32 1e-05, %v662_v14 }
 0x24b   : > { %1077 = vrsqrt.f32 %v663_v17 }
 0x255   : > { %v1078_v22 = vpop.eup %1077 }
 0x256   : > { %v665_v24 = vmul.f32 %v1078_v22, %v641_v57  ;;  %v666_v25 = vmul.f32 %v1078_v22, %v642_v55  ;;  %v667_v26 = vmul.f32 %v1078_v22, %v643_v56  ;;  %v668_v27 = vmul.f32 %v1078_v22, %v644_v2 }
 0x258   : > { %v693_v30 = vmul.f32 %v676_v15, %v665_v24  ;;  %v694_v31 = vmul.f32 %v681_v16, %v666_v25  ;;  %v695_v32 = vmul.f32 %v686_v18, %v667_v26  ;;  %v696_v33 = vmul.f32 %v691_v19, %v668_v27 }
 0x25a   : > { %v721_v36 = vadd.f32 %v704_v20, %v693_v30  ;;  %v722_v37 = vadd.f32 %v709_v21, %v694_v31  ;;  %v723_v38 = vadd.f32 %v714_v34, %v695_v32  ;;  %v724_v39 = vadd.f32 %v719_v35, %v696_v33 }
 0x25c   : > { %v725_v40 = vpack.c.bf16 %v722_v37, %v721_v36  ;;  %v726_v41 = vpack.c.bf16 %v724_v39, %v723_v38 }
 0x25e   : > { %740 = vrot.lane.b32.xlu1 %v725_v40, %s1087_s30  ;;  %742 = vrot.lane.b32.xlu0 %v726_v41, %s1087_s30 }
 0x2d0   : > { %v741_v42 = vpop.permute.xlu1 %740  ;;  %v743_v43 = vpop.permute.xlu0 %742 }
 0x2d1   : > { %746 = vxpose.xlu1.c.b16.start [1/2] (short) (narrow) %v741_v42, 16 }
 0x2d5   : > { %747 = vxpose.xlu1.c.b16.end [2/2] (short) (narrow) %v743_v43, 16 }
 0x337   : > { %v754_v44 = vpop.trf.xlu1 }
 0x338   : > { %954 = vmatmul.mubr.msk.bf16.vlgmr.msra.gmra.mrb[4].mxu1 %vm464_vm0, %v754_v44 }
 0x40b   : > { %v811_v46 = vpop.f32.mrb[4].mxu1 }
 0x40c   : > { %v812_v47 = vadd.f32 %v898_v45, %v811_v46  ;;  %v955_v48 = vpop.f32.mrb[5].mxu1 }
 0x40d   : > { %v814_v1 = vpop.f32.mrb[6].mxu1 }
 0x40e   : > { %v818_v49 = vrot.slane %v812_v47, 7  ;;  %v956_v0 = vpop.f32.mrb[7].mxu1 }
 0x410   : > { %v821_v50 = vsel %vm820_vm3, -5.0, %v818_v49  ;;  %825 = vst.msk [vmem:[%s278_s21 + $0x8] sm:$0x1] %vm824_vm4, %v818_v49 }
 0x411   : > { %823 = vst.msk [vmem:[%s278_s21] sm:$0xff] %vm822_vm5, %v821_v50 }
 0x412 PF: > { %s17_s24 = sadd.s32 1, %s1085_s24  }
 0x413   : > { %p14_p4 = scmp.ge.s32.totalorder %s17_s24, 4  }
 0x415   :  { %16 = sbr.rel (!%p14_p4) target bundleno = 1 (0x1), region = 78 }

</bundles_post_ra>
